<compile_context>
chip_gen: v6e
topology: v6e:2x2x1
jax: 0.10.0
libtpu: 0.0.40
codegen_flags: <defaults>
</compile_context>

<pallas_src>
from functools import partial

import jax
import jax.numpy as jnp
from jax.experimental import pallas as pl
from jax.experimental.pallas import tpu as pltpu


def _cross_en_swap_kernel(n_rows_total, sim_ref, tgt_ref, out_ref):
    # sim_ref: (TM, N) similarity tile (native dtype), rows of the matrix.
    # tgt_ref: (TM, 1) f32, per-row pre-selected logit
    #          (sim[i, 0] if the row is swapped, else sim[i, i]).
    # out_ref: (1, 1, 128) f32, this block's partial sum of -log terms
    #          broadcast across the 128 lanes (lane-dense, unmasked store).
    i = pl.program_id(0)

    s = sim_ref[...].astype(jnp.float32)               # upcast after tile load
    tm = s.shape[0]

    # Numerically-stable softmax pieces; `exp(s - m)` feeds only the row-sum,
    # so no (TM, N) probability matrix is materialized.
    m = jnp.max(s, axis=-1, keepdims=True)                       # (TM, 1)
    denom = jnp.sum(jnp.exp(s - m), axis=-1, keepdims=True)      # (TM, 1)

    # Selected softmax probability per row: only N exp/div/log, not N^2.
    picked = jnp.exp(tgt_ref[...] - m) / denom + 1e-8            # (TM, 1)
    neg_log = -jnp.log(picked)                                   # (TM, 1)

    # Mask rows of the last partial tile (padded rows must not contribute;
    # jnp.where also stops any garbage-row NaN/inf from leaking into the sum).
    local_rows = jax.lax.broadcasted_iota(jnp.int32, (tm, 1), 0)
    global_rows = i * tm + local_rows
    contrib = jnp.where(global_rows < n_rows_total, neg_log, 0.0)

    out_ref[...] = jnp.full((1, 1, 128), jnp.sum(contrib), dtype=out_ref.dtype)


def _tpu_vmem_capacity_bytes():
    try:
        return int(pltpu.get_tpu_info().vmem_capacity_bytes)
    except Exception:
        return 64 << 20  # conservative fallback: assume v7x-sized VMEM


def _choose_config(n_rows, n_cols):
    """Generation-aware (tile_rows, vmem_limit_bytes)."""
    vmem = _tpu_vmem_capacity_bytes()
    if vmem >= (100 << 20):          # v5e / v6e: 128 MiB VMEM per TensorCore
        budget_f32_bytes = 16 << 20
        vmem_limit = 96 << 20
    else:                            # v7x: 64 MiB VMEM per TensorCore
        budget_f32_bytes = 4 << 20
        vmem_limit = 48 << 20
    tm = budget_f32_bytes // max(1, n_cols * 4)
    tm = int((tm // 8) * 8)
    tm = max(8, min(tm, 1024))
    if tm >= n_rows:
        tm = n_rows                  # single tile / full dims (always legal)
    return tm, vmem_limit


def cross_en_swap(sim_matrix, gamma_vals=None, *, key=None, tile_rows=None):
    """Pallas implementation of CrossEn_Swap.forward.

    sim_matrix: (N, N) array (kept in its native dtype, e.g. bf16 or f32).
    gamma_vals: optional (N,) swap thresholds; row i is swapped when
                uniform(key)[i] > gamma_vals[i] (mirrors random.random()).
    """
    sim_matrix = jnp.asarray(sim_matrix)  # keep native dtype in HBM
    n, n_cols = sim_matrix.shape

    if gamma_vals is not None:
        if key is None:
            key = jax.random.PRNGKey(0)
        u = jax.random.uniform(key, (n,), dtype=jnp.float32)
        swap = u > jnp.asarray(gamma_vals, jnp.float32)
    else:
        # TODO(synk): the PyTorch module raises UnboundLocalError when
        # gamma_vals is None; we treat it as "no swap" instead.
        swap = jnp.zeros((n,), dtype=bool)

    # Pre-select the target logit per row in the wrapper (O(N) gathers only):
    # swapped rows take column 0, unswapped rows take the diagonal.
    rows = jnp.arange(n, dtype=jnp.int32)
    diag = sim_matrix[rows, rows].astype(jnp.float32)            # (N,)
    col0 = sim_matrix[:, 0].astype(jnp.float32)                  # (N,)
    s_target = jnp.where(swap, col0, diag).reshape(n, 1)         # (N, 1) f32

    tm, vmem_limit = _choose_config(n, n_cols)
    if tile_rows is not None:
        tm = tile_rows
    num_blocks = pl.cdiv(n, tm)

    partials = pl.pallas_call(
        partial(_cross_en_swap_kernel, n),
        out_shape=jax.ShapeDtypeStruct((num_blocks, 1, 128), jnp.float32),
        grid_spec=pltpu.PrefetchScalarGridSpec(
            num_scalar_prefetch=0,
            grid=(num_blocks,),
            in_specs=[
                pl.BlockSpec((tm, n_cols), lambda i: (i, 0)),
                pl.BlockSpec((tm, 1), lambda i: (i, 0)),
            ],
            out_specs=pl.BlockSpec((1, 1, 128), lambda i: (i, 0, 0)),
        ),
        compiler_params=pltpu.CompilerParams(
            dimension_semantics=("parallel",),   # independent per-block partials
            vmem_limit_bytes=vmem_limit,
        ),
    )(sim_matrix, s_target)

    # Tiny finishing reduction in XLA: mean of all per-row -log terms.
    return jnp.sum(partials[:, 0, 0]) / n


def _reference(sim_matrix, swap_mask):
    """Plain-JAX reference (same math as the torch module)."""
    pt0 = jax.nn.softmax(sim_matrix.astype(jnp.float32), axis=-1) + 1e-8
    n = sim_matrix.shape[0]
    idx = jnp.where(swap_mask > 0.5, 0, jnp.arange(n))
    diag = pt0[jnp.arange(n), idx]
    return jnp.mean(-jnp.log(diag))


if __name__ == "__main__":
    N = 8  # small square similarity matrix (batch of 8 query/candidate pairs)
    key = jax.random.PRNGKey(0)
    k_sim, k_gamma, k_swap = jax.random.split(key, 3)

    sim = jax.random.normal(k_sim, (N, N), dtype=jnp.float32)
    gamma_vals = jax.random.uniform(k_gamma, (N,), dtype=jnp.float32)

    loss = cross_en_swap(sim, gamma_vals, key=k_swap)
    loss = jax.block_until_ready(loss)

    # Self-check against plain-JAX reference using the same swap draws.
    u = jax.random.uniform(k_swap, (N,), dtype=jnp.float32)
    swap_mask = (u > gamma_vals).astype(jnp.float32)
    ref = _reference(sim, swap_mask)
    assert jnp.allclose(loss, ref, rtol=1e-5, atol=1e-6), (loss, ref)

    print("KERNEL_OK")
</pallas_src>

<mosaic_0001>
module attributes {stable_mosaic.version = 11 : i64} {
  func.func @_cross_en_swap_kernel(%arg0: i32, %arg1: memref<8x8xf32, #tpu.memory_space<vmem>>, %arg2: memref<8x1xf32, #tpu.memory_space<vmem>>, %arg3: memref<1x1x128xf32, #tpu.memory_space<vmem>>) attributes {dimension_semantics = [#tpu.dimension_semantics<parallel>], iteration_bounds = array<i64: 1>, scalar_prefetch = 0 : i64, scratch_operands = 0 : i64, tpu.core_type = #tpu.core_type<tc>, window_params = [{transform_indices = @transform_0, window_bounds = array<i64: 8, 8>}, {transform_indices = @transform_1, window_bounds = array<i64: 8, 1>}, {transform_indices = @transform_2, window_bounds = array<i64: 1, 1, 128>}]} {
    %c0 = arith.constant 0 : index
    %c0_0 = arith.constant 0 : index
    %0 = vector.load %arg1[%c0, %c0_0] : memref<8x8xf32, #tpu.memory_space<vmem>>, vector<8x8xf32>
    %cst = arith.constant dense<0xFF800000> : vector<8xf32>
    %1 = vector.multi_reduction <maximumf>, %0, %cst [1] : vector<8x8xf32> to vector<8xf32>
    %2 = vector.shape_cast %1 : vector<8xf32> to vector<8x1xf32>
    %3 = vector.broadcast %2 : vector<8x1xf32> to vector<8x8xf32>
    %4 = arith.subf %0, %3 : vector<8x8xf32>
    %5 = math.exp %4 : vector<8x8xf32>
    %cst_1 = arith.constant dense<0.000000e+00> : vector<8xf32>
    %6 = vector.multi_reduction <add>, %5, %cst_1 [1] : vector<8x8xf32> to vector<8xf32>
    %7 = vector.shape_cast %6 : vector<8xf32> to vector<8x1xf32>
    %c0_2 = arith.constant 0 : index
    %c0_3 = arith.constant 0 : index
    %8 = vector.load %arg2[%c0_2, %c0_3] : memref<8x1xf32, #tpu.memory_space<vmem>>, vector<8x1xf32>
    %9 = arith.subf %8, %2 : vector<8x1xf32>
    %10 = math.exp %9 : vector<8x1xf32>
    %11 = arith.divf %10, %7 : vector<8x1xf32>
    %cst_4 = arith.constant 9.99999993E-9 : f32
    %12 = vector.broadcast %cst_4 : f32 to vector<8x1xf32>
    %13 = arith.addf %11, %12 : vector<8x1xf32>
    %14 = math.log %13 : vector<8x1xf32>
    %cst_5 = arith.constant 0.000000e+00 : f32
    %15 = vector.broadcast %cst_5 : f32 to vector<8x1xf32>
    %16 = arith.subf %15, %14 : vector<8x1xf32>
    %17 = tpu.iota {dimensions = array<i32: 0>} : vector<8x1xi32>
    %c8_i32 = arith.constant 8 : i32
    %18 = arith.muli %arg0, %c8_i32 : i32
    %19 = vector.broadcast %18 : i32 to vector<8x1xi32>
    %20 = arith.addi %19, %17 : vector<8x1xi32>
    %c8_i32_6 = arith.constant 8 : i32
    %21 = vector.broadcast %c8_i32_6 : i32 to vector<8x1xi32>
    %22 = arith.cmpi slt, %20, %21 : vector<8x1xi32>
    %cst_7 = arith.constant 0.000000e+00 : f32
    %23 = vector.broadcast %cst_7 : f32 to vector<8x1xf32>
    %24 = arith.select %22, %16, %23 : vector<8x1xi1>, vector<8x1xf32>
    %25 = vector.shape_cast %24 : vector<8x1xf32> to vector<1x8x1xf32>
    %cst_8 = arith.constant dense<0.000000e+00> : vector<1xf32>
    %26 = vector.multi_reduction <add>, %25, %cst_8 [1, 2] : vector<1x8x1xf32> to vector<1xf32>
    %27 = vector.shape_cast %26 : vector<1xf32> to vector<1x1x1xf32>
    %28 = vector.extract %27[0, 0, 0] : f32 from vector<1x1x1xf32>
    %29 = vector.broadcast %28 : f32 to vector<1x1x128xf32>
    %c0_9 = arith.constant 0 : index
    %c0_10 = arith.constant 0 : index
    %c0_11 = arith.constant 0 : index
    %30 = vector.load %arg3[%c0_9, %c0_10, %c0_11] : memref<1x1x128xf32, #tpu.memory_space<vmem>>, vector<1x1x128xf32>
    tpu.vector_store %arg3[%c0_9, %c0_10, %c0_11], %29 {strides = array<i32>} : memref<1x1x128xf32, #tpu.memory_space<vmem>>, vector<1x1x128xf32>,
    return
  }
  func.func @transform_0(%arg0: i32) -> (i32, i32) {
    %c0_i32 = arith.constant 0 : i32
    %c0_i32_0 = arith.constant 0 : i32
    return %arg0, %c0_i32 : i32, i32
  }
  func.func @transform_1(%arg0: i32) -> (i32, i32) {
    %c0_i32 = arith.constant 0 : i32
    %c0_i32_0 = arith.constant 0 : i32
    return %arg0, %c0_i32 : i32, i32
  }
  func.func @transform_2(%arg0: i32) -> (i32, i32, i32) {
    %c0_i32 = arith.constant 0 : i32
    %c0_i32_0 = arith.constant 0 : i32
    %c0_i32_1 = arith.constant 0 : i32
    return %arg0, %c0_i32, %c0_i32_0 : i32, i32, i32
  }
}

</mosaic_0001>

<bundles_post_ra>
// kernel: tpu_custom_call.1
= control target key start
LH: loop header
LB: loop body
LE: loop exit
PB: predicated region body
PF: predicated region fallthrough
CT: control target
= control target key end

     0   :  { %vm13_vm0 = vcmask 64512   ;;  %s125_s0 = inlined_call_operand.vmem [shape: f32[8,8], index: 0, kind: input, shape index: {}]   ;;  %s126_s1 = inlined_call_operand.vmem [shape: f32[8,1], index: 1, kind: input, shape index: {}]   ;;  %s127_s2 = inlined_call_operand.hbm [shape: f32[1,1,128], index: 2, kind: output, shape index: {}]  }
   0x1   :  { %v12_v0 = vld [vmem:[%s125_s0] sm:$0xff] }
   0x2   :  { %7 = vsyncpa [#allocation3], 0  ;;  %v14_v1 = vsel %vm13_vm0, %v12_v0, -inf  ;;  %v23_v7 = vld [vmem:[%s126_s1] sm:$0xff]  ;;  %vm40_vm1 = vcmask 7168   ;;  %s100_s0 = smov [#allocation2]  }
   0x3   :  { %15 = vmax.xlane.f32.xlu0 %v14_v1  ;;  %s59_s1 = sshll.u32 %s100_s0, 4  ;;  %s60_s1 = int_to_ptr.vmem [resolvable:$true] %s59_s1 }
   0x4   :  { %s78_s14 = scalar_lea.vmem %s60_s1, 16  ;;  %s82_s15 = scalar_lea.vmem %s60_s1, 32 }
   0x5   :  { %p79_p0 = scmp.ne.s32.totalorder %s60_s1, %s78_s14  ;;  %p83_p1 = scmp.lt.s32.totalorder %s60_s1, %s60_s1 }
   0x6   :  { %p84_p2 = scmp.lt.s32.totalorder %s82_s15, %s78_s14 }
   0x8   :  { %p85_p3 = por %p84_p2, %p83_p1 }
   0xa   :  { %p86_p4 = pnand %p85_p3, %p79_p0 }
  0x8c   :  { %v16_v2 = vpop.xlane.xlu0 %15 }
  0x8d   :  { %v17_v3 = vsub.f32 %v12_v0, %v16_v2  ;;  %v24_v8 = vsub.f32 %v23_v7, %v16_v2 }
  0x8f   :  { %v18_v4 = vmul.f32 1.442695, %v17_v3  ;;  %v25_v9 = vmul.f32 1.442695, %v24_v8 }
  0x91   :  { %70 = vpow2.f32 %v18_v4 }
  0x92   :  { %72 = vpow2.f32 %v25_v9 }
  0x9e   :  { %v71_v5 = vpop.eup %70 }
  0x9f   :  { %v20_v6 = vsel %vm13_vm0, %v71_v5, 0.0  ;;  %v73_v11 = vpop.eup %72 }
  0xa0   :  { %21 = vadd.xlane.f32.xlu0 %v20_v6 }
 0x129   :  { %v22_v10 = vpop.xlane.xlu0 %21 }
 0x12a   :  { %74 = vrcp.f32 %v22_v10 }
 0x137   :  { %v75_v12 = vpop.eup %74 }
 0x138   :  { %v28_v13 = vmul.f32 %v75_v12, %v73_v11 }
 0x13a   :  { %v29_v14 = vadd.f32 1e-08, %v28_v13 }
 0x13c   :  { %76 = vlog2.f32 %v29_v14 }
 0x149   :  { %v77_v15 = vpop.eup %76 }
 0x14a   :  { %v31_v16 = vmul.f32 0.6931472, %v77_v15 }
 0x14c   :  { %v32_v17 = vsub.f32 0.0, %v31_v16 }
 0x14e   :  { %v41_v18 = vsel %vm40_vm1, %v32_v17, 0.0 }
 0x14f   :  { %42 = vadd.xlane.f32.xlu1 %v41_v18 }
 0x1d8   :  { %v43_v19 = vpop.xlane.xlu1 %42 }
 0x1d9   :  { %v44_v20 = vrot.slane %v43_v19, 4 }
 0x1db   :  { %v45_v21 = vadd.f32 %v44_v20, %v43_v19 }
 0x1dd   :  { %v46_v22 = vrot.slane %v45_v21, 2 }
 0x1df   :  { %v47_v23 = vadd.f32 %v46_v22, %v45_v21 }
 0x1e1   :  { %v48_v24 = vrot.slane %v47_v23, 1 }
 0x1e3   :  { %v49_v25 = vadd.f32 %v48_v24, %v47_v23 }
 0x1e5   :  { %67 = vpush %v49_v25 }
 0x216   :  { %s68_s13 = spop %67 }
 0x217   :  { %v51_v26 = vstv %s68_s13 }
 0x218   :  { %52 = vst [vmem:[#allocation2] sm:$0x1] %v51_v26 }
 0x219   :  { %89 = shalt.err (!%p86_p4)
}
 0x21a   :  { %62 = dma.vmem_to_hbm [thread:$0]  %s60_s1, 16, %s127_s2, [#allocation3]  }
 0x21b   :  { %98 = dma.done.wait [#allocation3], 16  }
 0x21c   :  { %99 = vsyncadd [#allocation3], 4294967280 }
 0x21d   :  { %66 = vsyncpa [#allocation3], 1 }

</bundles_post_ra>
